<compile_context>
chip_gen: v7x
topology: tpu7x:2x2x1
jax: 0.10.0
libtpu: 0.0.40
codegen_flags: <defaults>
</compile_context>

<pallas_src>
import jax
import jax.numpy as jnp
import numpy as np
from jax.experimental import pallas as pl
from jax.experimental.pallas import tpu as pltpu


def _round_up(v, m):
    return ((v + m - 1) // m) * m


def smm_kernel(perm_ref, row_ref, xg_ref, o_ref, acc_ref):
    """One (K-tile, E-tile) grid step of  out[k] = sum_e [row[e]==perm[k]] * xg[e].

    perm_ref: VMEM (TK, 1)  int32   kept-node ids of this K tile (-1 = padding)
    row_ref : VMEM (1, TE)  int32   row endpoint of this E tile  (-2 = dropped/padded edge)
    xg_ref  : VMEM (TE, Fp)         pre-gathered neighbor features x[col[e]] (streamed)
    o_ref   : VMEM (TK, Fp)         output tile
    acc_ref : VMEM (TK, Fp) f32     accumulator over E tiles
    """
    ei = pl.program_id(1)

    @pl.when(ei == 0)
    def _init():
        acc_ref[...] = jnp.zeros_like(acc_ref)

    # Edge-selection one-hot -> single MXU matmul, accumulated in f32.
    # Padded perm rows (-1) and dropped/padded edges (-2) can never match (ids >= 0).
    r = (perm_ref[...] == row_ref[...]).astype(xg_ref.dtype)          # (TK, TE)
    acc_ref[...] += jnp.dot(r, xg_ref[...], preferred_element_type=jnp.float32)

    @pl.when(ei == pl.num_programs(1) - 1)
    def _finalize():
        o_ref[...] = acc_ref[...].astype(o_ref.dtype)


def smm_forward(x, edge_index, perm, *, tk=256, te=1024):
    """Pallas equivalent of Smm.forward(original_x, original_edge_index, perm)."""
    N, F = x.shape
    E = edge_index.shape[1]
    K = perm.shape[0]

    perm = perm.astype(jnp.int32)
    row = edge_index[0].astype(jnp.int32)
    col = edge_index[1].astype(jnp.int32)

    # add_remaining_self_loops + filter_topk_neighbor, re-expressed as an augmented
    # edge list:
    #   * original self loops are dropped by overwriting their row with -2,
    #   * one fresh self loop (p, p) per kept node is appended,
    #   * the "row must be in perm" filter happens inside the kernel via R[k, e].
    # TODO(synk): duplicate self loops in the input would be collapsed differently than
    # PyG's add_remaining_self_loops (multiplicity is lost) — irrelevant for simple graphs.
    row_eff = jnp.where(row == col, jnp.int32(-2), row)
    row_aug = jnp.concatenate([row_eff, perm])
    col_aug = jnp.concatenate([col, perm])
    e_aug = E + K

    # Gather neighbor features once in the wrapper (single XLA gather); the kernel then
    # streams these rows as an ordinary double-buffered pipelined input.
    xg = jnp.take(x, col_aug, axis=0)                                 # (E + K, F)

    Fp = _round_up(F, 128)                                            # lane-dense output
    tk = min(_round_up(tk, 8), _round_up(K, 8))
    te = min(_round_up(te, 128), _round_up(e_aug, 128))
    kp = _round_up(K, tk)
    ep = _round_up(e_aug, te)

    # Padding: perm -> -1, edge rows -> -2 (never match), padded xg rows/cols -> 0.
    perm_p = jnp.full((kp,), -1, jnp.int32).at[:K].set(perm).reshape(kp, 1)
    row_p = jnp.full((ep,), -2, jnp.int32).at[:e_aug].set(row_aug).reshape(1, ep)
    xg_p = jnp.zeros((ep, Fp), x.dtype).at[:e_aug, :F].set(xg)

    itemsize = jnp.dtype(x.dtype).itemsize
    vmem_need = (
        2 * tk * 128 * 4          # perm tile (lane-padded), double-buffered
        + 2 * 8 * te * 4          # row tile (sublane-padded), double-buffered
        + 2 * te * Fp * itemsize  # streamed xg tiles, double-buffered
        + 2 * tk * Fp * itemsize  # output tile, double-buffered
        + tk * Fp * 4             # f32 accumulator
    )
    try:
        vmem_cap = pltpu.get_tpu_info().vmem_capacity_bytes
    except Exception:
        vmem_cap = 64 * 2**20
    vmem_limit = int(min(0.8 * vmem_cap, max(32 * 2**20, 2 * vmem_need)))

    grid = (kp // tk, ep // te)

    out = pl.pallas_call(
        smm_kernel,
        out_shape=jax.ShapeDtypeStruct((kp, Fp), x.dtype),
        grid_spec=pltpu.PrefetchScalarGridSpec(
            num_scalar_prefetch=0,
            grid=grid,
            in_specs=[
                pl.BlockSpec((tk, 1), lambda ki, ei: (ki, 0)),    # perm tile
                pl.BlockSpec((1, te), lambda ki, ei: (0, ei)),    # edge rows tile
                pl.BlockSpec((te, Fp), lambda ki, ei: (ei, 0)),   # gathered features tile
            ],
            out_specs=pl.BlockSpec((tk, Fp), lambda ki, ei: (ki, 0)),
            scratch_shapes=[
                pltpu.VMEM((tk, Fp), jnp.float32),                # f32 accumulator
            ],
        ),
        compiler_params=pltpu.CompilerParams(
            dimension_semantics=("parallel", "arbitrary"),
            vmem_limit_bytes=vmem_limit,
        ),
    )(perm_p, row_p, xg_p)

    return out[:K, :F]


def ref_forward(x, edge_index, perm):
    """Literal numpy transcription of the torch forward (for verification)."""
    N, F = x.shape
    row, col = edge_index[0], edge_index[1]
    keep = row != col
    row = np.concatenate([row[keep], np.arange(N)])
    col = np.concatenate([col[keep], np.arange(N)])
    mask = np.full((N,), -1, dtype=np.int64)
    mask[perm] = np.arange(perm.shape[0])
    sel = mask[row] >= 0
    row, col = row[sel], col[sel]
    out = np.zeros((N, F), dtype=np.float32)
    np.add.at(out, row, x[col])
    return out[perm]


if __name__ == "__main__":
    key = jax.random.PRNGKey(0)
    N, F, E, K = 64, 96, 300, 40
    k1, k2, k3, k4 = jax.random.split(key, 4)

    x = jax.random.normal(k1, (N, F), dtype=jnp.float32)
    row = jax.random.randint(k2, (E,), 0, N, dtype=jnp.int32)
    col = jax.random.randint(k3, (E,), 0, N, dtype=jnp.int32)
    edge_index = jnp.stack([row, col], axis=0)
    perm = jax.random.permutation(k4, N)[:K].astype(jnp.int32)  # unique kept-node ids

    # Small tiles so the demo exercises multiple K tiles (parallel axis), multiple E tiles
    # (accumulation with pl.when init/finalize) and padding on K, E and F (96 -> 128).
    out = jax.block_until_ready(smm_forward(x, edge_index, perm, tk=16, te=128))

    ref = ref_forward(np.asarray(x), np.asarray(edge_index), np.asarray(perm))
    assert out.shape == (K, F)
    np.testing.assert_allclose(np.asarray(out), ref, rtol=1e-5, atol=1e-4)

    # bf16 feature path: bf16 MXU operands with f32 accumulation, bf16 output.
    out_bf16 = jax.block_until_ready(
        smm_forward(x.astype(jnp.bfloat16), edge_index, perm, tk=16, te=128))
    ref_bf16 = ref_forward(np.asarray(x.astype(jnp.bfloat16), dtype=np.float32),
                           np.asarray(edge_index), np.asarray(perm))
    np.testing.assert_allclose(np.asarray(out_bf16, dtype=np.float32), ref_bf16,
                               rtol=5e-2, atol=5e-2)

    # Default (large-tile) config on the same data to make sure tk=256/te=1024 clamping
    # and the single-tile path also compile and run.
    out_big = jax.block_until_ready(smm_forward(x, edge_index, perm))
    np.testing.assert_allclose(np.asarray(out_big), ref, rtol=1e-5, atol=1e-4)

    print("KERNEL_OK")
</pallas_src>

<mosaic_0001>
module attributes {stable_mosaic.version = 11 : i64} {
  func.func @smm_kernel(%arg0: i32, %arg1: i32, %arg2: memref<16x1xi32, #tpu.memory_space<vmem>>, %arg3: memref<1x128xi32, #tpu.memory_space<vmem>>, %arg4: memref<128x128xf32, #tpu.memory_space<vmem>>, %arg5: memref<16x128xf32, #tpu.memory_space<vmem>>, %arg6: memref<16x128xf32, #tpu.memory_space<vmem>>) attributes {dimension_semantics = [#tpu.dimension_semantics<parallel>, #tpu.dimension_semantics<arbitrary>], iteration_bounds = array<i64: 3, 3>, scalar_prefetch = 0 : i64, scratch_operands = 1 : i64, tpu.core_type = #tpu.core_type<tc>, window_params = [{transform_indices = @transform_0, window_bounds = array<i64: 16, 1>}, {transform_indices = @transform_1, window_bounds = array<i64: 1, 128>}, {transform_indices = @transform_2, window_bounds = array<i64: 128, 128>}, {transform_indices = @transform_3, window_bounds = array<i64: 16, 128>}]} {
    %c0_i32 = arith.constant 0 : i32
    %0 = arith.cmpi eq, %arg1, %c0_i32 : i32
    %1 = arith.extui %0 : i1 to i32
    %c0_i32_0 = arith.constant 0 : i32
    %2 = arith.cmpi ne, %1, %c0_i32_0 : i32
    scf.if %2 {
      %cst_11 = arith.constant 0.000000e+00 : f32
      %18 = vector.broadcast %cst_11 : f32 to vector<16x128xf32>
      %c0_12 = arith.constant 0 : index
      %c0_13 = arith.constant 0 : index
      %19 = vector.load %arg6[%c0_12, %c0_13] : memref<16x128xf32, #tpu.memory_space<vmem>>, vector<16x128xf32>
      tpu.vector_store %arg6[%c0_12, %c0_13], %18 {strides = array<i32>} : memref<16x128xf32, #tpu.memory_space<vmem>>, vector<16x128xf32>,
    } else {
    }
    %c0 = arith.constant 0 : index
    %c0_1 = arith.constant 0 : index
    %3 = vector.load %arg2[%c0, %c0_1] : memref<16x1xi32, #tpu.memory_space<vmem>>, vector<16x1xi32>
    %c0_2 = arith.constant 0 : index
    %c0_3 = arith.constant 0 : index
    %4 = vector.load %arg3[%c0_2, %c0_3] : memref<1x128xi32, #tpu.memory_space<vmem>>, vector<1x128xi32>
    %5 = vector.broadcast %3 : vector<16x1xi32> to vector<16x128xi32>
    %6 = vector.broadcast %4 : vector<1x128xi32> to vector<16x128xi32>
    %7 = arith.cmpi eq, %5, %6 : vector<16x128xi32>
    %8 = arith.extui %7 : vector<16x128xi1> to vector<16x128xi32>
    %9 = arith.sitofp %8 : vector<16x128xi32> to vector<16x128xf32>
    %c0_4 = arith.constant 0 : index
    %c0_5 = arith.constant 0 : index
    %10 = vector.load %arg6[%c0_4, %c0_5] : memref<16x128xf32, #tpu.memory_space<vmem>>, vector<16x128xf32>
    %c0_6 = arith.constant 0 : index
    %c0_7 = arith.constant 0 : index
    %11 = vector.load %arg4[%c0_6, %c0_7] : memref<128x128xf32, #tpu.memory_space<vmem>>, vector<128x128xf32>
    %cst = arith.constant dense<0.000000e+00> : vector<16x128xf32>
    %12 = tpu.matmul %9, %11, %cst {dimension_numbers = #tpu.dot_dimension_numbers<[1], [0], [0], [1], [0, 0, 1, 1], [], []>} : vector<16x128xf32>, vector<128x128xf32>, vector<16x128xf32> -> vector<16x128xf32>
    %13 = arith.addf %10, %12 : vector<16x128xf32>
    %c0_8 = arith.constant 0 : index
    %c0_9 = arith.constant 0 : index
    %14 = vector.load %arg6[%c0_8, %c0_9] : memref<16x128xf32, #tpu.memory_space<vmem>>, vector<16x128xf32>
    tpu.vector_store %arg6[%c0_8, %c0_9], %13 {strides = array<i32>} : memref<16x128xf32, #tpu.memory_space<vmem>>, vector<16x128xf32>,
    %c2_i32 = arith.constant 2 : i32
    %15 = arith.cmpi eq, %arg1, %c2_i32 : i32
    %16 = arith.extui %15 : i1 to i32
    %c0_i32_10 = arith.constant 0 : i32
    %17 = arith.cmpi ne, %16, %c0_i32_10 : i32
    scf.if %17 {
      %c0_11 = arith.constant 0 : index
      %c0_12 = arith.constant 0 : index
      %18 = vector.load %arg6[%c0_11, %c0_12] : memref<16x128xf32, #tpu.memory_space<vmem>>, vector<16x128xf32>
      %c0_13 = arith.constant 0 : index
      %c0_14 = arith.constant 0 : index
      %19 = vector.load %arg5[%c0_13, %c0_14] : memref<16x128xf32, #tpu.memory_space<vmem>>, vector<16x128xf32>
      tpu.vector_store %arg5[%c0_13, %c0_14], %18 {strides = array<i32>} : memref<16x128xf32, #tpu.memory_space<vmem>>, vector<16x128xf32>,
    } else {
    }
    return
  }
  func.func @transform_0(%arg0: i32, %arg1: i32) -> (i32, i32) {
    %c0_i32 = arith.constant 0 : i32
    %c0_i32_0 = arith.constant 0 : i32
    return %arg0, %c0_i32 : i32, i32
  }
  func.func @transform_1(%arg0: i32, %arg1: i32) -> (i32, i32) {
    %c0_i32 = arith.constant 0 : i32
    %c0_i32_0 = arith.constant 0 : i32
    return %c0_i32, %arg1 : i32, i32
  }
  func.func @transform_2(%arg0: i32, %arg1: i32) -> (i32, i32) {
    %c0_i32 = arith.constant 0 : i32
    %c0_i32_0 = arith.constant 0 : i32
    return %arg1, %c0_i32 : i32, i32
  }
  func.func @transform_3(%arg0: i32, %arg1: i32) -> (i32, i32) {
    %c0_i32 = arith.constant 0 : i32
    %c0_i32_0 = arith.constant 0 : i32
    return %arg0, %c0_i32 : i32, i32
  }
}

</mosaic_0001>

<bundles_post_ra>
// kernel: tpu_custom_call.1
= control target key start
LH: loop header
LB: loop body
LE: loop exit
PB: predicated region body
PF: predicated region fallthrough
CT: control target
= control target key end

     0   :  { %s1157_s0 = inlined_call_operand.vmem [shape: s32[48,1], index: 0, kind: input, shape index: {}]   ;;  %s1158_s1 = inlined_call_operand.vmem [shape: s32[1,384], index: 1, kind: input, shape index: {}]   ;;  %s1159_s2 = inlined_call_operand.hbm [shape: f32[384,128], index: 2, kind: input, shape index: {}]   ;;  %s1160_s3 = inlined_call_operand.hbm [shape: f32[48,128], index: 3, kind: output, shape index: {}]  }
   0x1   :  { %1163 = sst [smem:[#allocation10_spill]] %s1159_s2 }
   0x2   :  { %8 = vsyncpa [#allocation4], 0 }
   0x3   :  { %10 = vsyncpa [#allocation4 + $0x1], 0 }
   0x4   :  { %11 = vsyncpa [#allocation5], 0 }
   0x5   :  { %13 = vsyncpa [#allocation5 + $0x1], 0  ;;  %s892_s12 = smov 0   ;;  %s894_s13 = smov 0  }
   0x6   :  { %s896_s14 = smov 0   ;;  %s898_s15 = smov 0  }
   0x7   :  { %s900_s16 = smov 0   ;;  %s902_s17 = smov 0  }
   0x8   :  { %s904_s18 = smov 0   ;;  %s906_s19 = smov 0  }
   0x9   :  { %s908_s20 = smov 0   ;;  %s910_s21 = smov 0  }
   0xa   :  { %s912_s22 = smov 0  }
   0xb LB: > { %s488_s23 = sadd.s32 4294967295, %s861_s22   ;;  %s489_s24 = sadd.s32 4294967294, %s861_s22   ;;  %s861_s22 = sphi %s912_s22, %s19_s22   ;;  %s857_s21 = sphi %s910_s21, %s1183_s21   ;;  %s853_s20 = sphi %s908_s20, %s1182_s20   ;;  %s849_s19 = sphi %s906_s19, %s1181_s19   ;;  %s845_s18 = sphi %s904_s18, %s1180_s18   ;;  %s841_s17 = sphi %s902_s17, %s1179_s17   ;;  %s837_s16 = sphi %s900_s16, %s1178_s16   ;;  %s833_s15 = sphi %s898_s15, %s1177_s15   ;;  %s829_s14 = sphi %s896_s14, %s1176_s14   ;;  %s825_s13 = sphi %s894_s13, %s1175_s13   ;;  %s821_s12 = sphi %s892_s12, %s1174_s12  }
   0xc   : > { %s28_s25 = sadd.s32 1, %s853_s20  ;;  %s31_s26 = sadd.s32 1, %s857_s21 }
   0xd   : > { %p29_p0 = scmp.ge.s32.totalorder %s28_s25, 3  ;;  %s90_s27 = sadd.s32 1, %s841_s17 }
   0xe   : > { %p97_p1 = scmp.ne.s32.totalorder %s841_s17, %s837_s16  ;;  %p98_p2 = scmp.eq.s32.totalorder %s861_s22, 0 }
   0xf   : > { %s1185_s25 = smov (%p29_p0, %s28_s25), 0  ;;  %s1187_s26 = smov (!%p29_p0, %s31_s26), %s857_s21 }
  0x10   : > { %s87_s28 = ssub.s32 %s853_s20, %s1185_s25  ;;  %p958_p3 = por %p98_p2, %p97_p1 }
  0x11   : > { %p33_p4 = scmp.ge.s32.totalorder %s1187_s26, 3  ;;  %p88_p5 = scmp.eq.s32.totalorder %s87_s28, 0 }
  0x12   : > { %p103_p6 = scmp.ne.s32.totalorder %s837_s16, %s833_s15  ;;  %p104_p7 = scmp.eq.s32.totalorder %s488_s23, 0 }
  0x13   : > { %s1189_s26 = smov (%p33_p4, %s1187_s26), 0  ;;  %s116_s6 = sadd.s32 1, %s829_s14 }
  0x14   : > { %1165 = sst [smem:[#allocation9_spill]] %s1189_s26  ;;  %p968_p8 = por %p104_p7, %p103_p6 }
  0x15   : > { %s966_s30 = scalar_select %p88_p5, %s841_s17, %s90_s27  }
  0x16   : > { %s113_s5 = ssub.s32 %s857_s21, %s1189_s26  ;;  %p126_p10 = scmp.ne.s32.totalorder %s829_s14, %s825_s13 }
  0x17   : > { %p114_p9 = scmp.eq.s32.totalorder %s113_s5, 0  ;;  %p127_p11 = scmp.eq.s32.totalorder %s488_s23, 8 }
  0x18   : > { %p132_p13 = scmp.ne.s32.totalorder %s825_s13, %s821_s12  ;;  %p133_p0 = scmp.eq.s32.totalorder %s489_s24, 8 }
  0x19   : > { %s978_s7 = scalar_select %p114_p9, %s829_s14, %s116_s6  }
  0x1a   : > { %p980_p12 = por %p127_p11, %p126_p10  ;;  %p611_p1 = scmp.lt.s32.totalorder %s861_s22, 9 }
  0x1b   : > { %s168_s9 = sand.u32 1, %s841_s17   ;;  %p988_p2 = por %p133_p0, %p132_p13 }
  0x1c   : > { %s1167_s8 = scalar_select %p980_p12, 1, 0 }
  0x1d   : > { %s1168_s10 = scalar_select %p988_p2, 1, 0 }
  0x1e   : > { %s492_s11 = sshll.u32 %s168_s9, 7  ;;  %s512_s15 = sshll.u32 %s853_s20, 11 }
  0x1f   : > { %s1169_s2 = sld [smem:[#allocation10_spill]]  ;;  %s172_s5 = scalar_lea.vmem [#allocation3], %s492_s11 }
  0x20   : > { %s179_s6 = sshll.u32 %s172_s5, 4  ;;  %p1000_p4 = pnand %p611_p1, %p958_p3  ;;  %s1004_s6 = int_to_ptr.vmem [resolvable:$true] %s179_s6 }
  0x21   : > { %s1006_s26 = scalar_lea.sflag [#allocation4], %s168_s9 }
  0x22   : > { %p711_p6 = pneg %p1000_p4 }
  0x25   : > { %s996_s23 = scalar_lea.hbm %s1169_s2, %s512_s15  ;;  %s714_s15 = scalar_lea.hbm %s1169_s2, 6144 }
  0x26   : > { %s709_s27 = scalar_lea.hbm %s996_s23, 2048  ;;  %p715_p3 = scmp.lt.u32.totalorder %s996_s23, %s1169_s2 }
  0x27   : > { %p710_p5 = scmp.ne.s32.totalorder %s996_s23, %s709_s27  ;;  %p716_p10 = scmp.lt.u32.totalorder %s714_s15, %s709_s27 }
  0x28   : > { %p718_p13 = scmp.lt.u32.totalorder %s709_s27, %s996_s23 }
  0x29   : > { %p712_p7 = pnand %p711_p6, %p710_p5  ;;  %p717_p11 = por %p716_p10, %p715_p3 }
  0x2b   : > { %p713_p9 = pneg %p712_p7  ;;  %p719_p0 = por %p718_p13, %p717_p11 }
  0x2d   : > { %p720_p1 = pnand %p719_p0, %p713_p9 }
  0x2f   : > { %723 = shalt.err (!%p720_p1)
}
  0x30   : > { %s724_s9 = scalar_lea.vmem %s1004_s6, 2048  ;;  %s863_s11 = smov [#allocation3]  }
  0x31   : > { %p725_p5 = scmp.ne.s32.totalorder %s1004_s6, %s724_s9  ;;  %s729_s29 = sshll.u32 %s863_s11, 4  ;;  %s730_s29 = int_to_ptr.vmem [resolvable:$false] %s729_s29 }
  0x32   : > { %s731_s28 = scalar_lea.vmem %s730_s29, 4096  ;;  %p732_p12 = scmp.lt.s32.totalorder %s1004_s6, %s730_s29 }
  0x33   : > { %p727_p7 = pnand %p725_p5, %p711_p6  ;;  %p733_p3 = scmp.lt.s32.totalorder %s731_s28, %s724_s9 }
  0x35   : > { %p728_p2 = pneg %p727_p7  ;;  %p734_p10 = por %p733_p3, %p732_p12 }
  0x37   : > { %p735_p11 = pnand %p734_p10, %p728_p2 }
  0x39   : > { %738 = shalt.err (!%p735_p11)
}
  0x3a   : > { %s864_s27 = smov 128   ;;  %s865_s15 = smov 8  }
  0x3b   : > { %606 = dma.hbm_to_vmem [thread:$0]  (!%p1000_p4), %s996_s23, 2048, %s1004_s6, %s1006_s26, %s864_s27, %s864_s27, %s865_s15  }
  0x3c   : > { %p495_p6 = scmp.ge.s32.totalorder %s861_s22, 1  ;;  %p187_p9 = scmp.lt.s32.totalorder %s861_s22, 10 }
  0x3e   : > { %p188_p13 = pnand %p495_p6, %p187_p9 }
  0x3f   : > { %s193_s5 = sand.u32 (!%p188_p13), 1, %s837_s16  }
  0x40   : > { %191 = sbr.rel (%p188_p13) target bundleno = 469 (0x1d5), region = 32  ;;  %s496_s9 = sshll.u32 (!%p188_p13), %s193_s5, 7 }
  0x41   : > { %s194_s11 = scalar_lea.sflag (!%p188_p13), [#allocation4], %s193_s5  ;;  %s1037_s29 = scalar_lea.vmem (!%p188_p13), [#allocation3], %s496_s9 }
  0x47   : > { %812 = dma.done.wait (%p968_p8), %s194_s11, 2048  }
  0x48   : > { %814 = vsyncadd (%p968_p8), %s194_s11, 4294965248  ;;  %s225_s26 = sand.u32 1, %s825_s13   ;;  %s498_s23 = sshll.u32 %s849_s19, 1 }
  0x49   : > { %s497_s6 = sshll.u32 %s225_s26, 4  ;;  %p229_p12 = scmp.lt.s32.totalorder %s498_s23, 5 }
  0x4a   : > { %p234_p2 = scmp.lt.s32.totalorder %s845_s18, 2  ;;  %s1058_s2 = scalar_lea.vmem [#allocation6], %s497_s6 }
  0x4b   : > { %s1191_s23 = smov (!%p229_p12, %s498_s23), 5  ;;  %p500_p8 = scmp.ne.s32.totalorder %s845_s18, 0 }
  0x4c   : > { %s1049_s24 = scalar_select %p234_p2, %s845_s18, 2 }
  0x4d   : > { %s499_s28 = sshll.u32 %s1191_s23, 3  ;;  %242 = sbr.rel (%p500_p8) target bundleno = 84 (0x54), region = 40  ;;  %v866_v0 = vmov (!%p500_p8), 0.0  }
  0x4e   : > { %s232_s4 = scalar_lea.vmem %s1157_s0, %s499_s28  ;;  %s236_s11 = scalar_lea.vmem %s1158_s1, %s1049_s24  ;;  %243 = vst [vmem:[#allocation2] sm:$0xff] (!%p500_p8), %v866_v0  ;;  %244 = vst [vmem:[#allocation2 + $0x8] sm:$0xff] (!%p500_p8), %v866_v0 }
  0x54 PF: > { %v245_v1 = vld [vmem:[%s232_s4] sm:$0xff]  ;;  %v266_v2 = vld [vmem:[%s1037_s29] sm:$0xff]  ;;  %v867_v3 = vmov 0   ;;  %v267_v4 = vld [vmem:[%s1037_s29 + $0x8] sm:$0xff]  ;;  %v868_v30 = vmov 1.0   ;;  %p506_p4 = scmp.ne.s32.totalorder %s845_s18, 2 }
  0x55   : > { %708 = vset.pattern.permute.xlu0 %v867_v3  ;;  %v268_v5 = vld [vmem:[%s1037_s29 + $0x10] sm:$0xff]  ;;  %v269_v6 = vld [vmem:[%s1037_s29 + $0x18] sm:$0xff]  ;;  %v567_v7 = vpack.c.bf16 %v267_v4, %v266_v2  ;;  %v246_v9 = vld [vmem:[%s232_s4 + $0x8] sm:$0xff] }
  0x56   : > { %249 = vperm.xlu0 %708, %v245_v1   ;;  %v571_v8 = vpack.c.bf16 %v269_v6, %v268_v5  ;;  %v270_v10 = vld [vmem:[%s1037_s29 + $0x20] sm:$0xff]  ;;  %v271_v11 = vld [vmem:[%s1037_s29 + $0x28] sm:$0xff]  ;;  %v272_v13 = vld [vmem:[%s1037_s29 + $0x30] sm:$0xff] }
  0x57   : > { %568 = vmatprep.subr.bf16.mxu0 %v567_v7  ;;  %v575_v12 = vpack.c.bf16 %v271_v11, %v270_v10  ;;  %v273_v14 = vld [vmem:[%s1037_s29 + $0x38] sm:$0xff]  ;;  %v274_v16 = vld [vmem:[%s1037_s29 + $0x40] sm:$0xff]  ;;  %v275_v17 = vld [vmem:[%s1037_s29 + $0x48] sm:$0xff] }
  0x58   : > { %570 = vmatpush3.bf16.msra.mxu0 %v567_v7  ;;  %v579_v15 = vpack.c.bf16 %v273_v14, %v272_v13  ;;  %v583_v18 = vpack.c.bf16 %v275_v17, %v274_v16  ;;  %v276_v19 = vld [vmem:[%s1037_s29 + $0x50] sm:$0xff]  ;;  %v277_v20 = vld [vmem:[%s1037_s29 + $0x58] sm:$0xff]  ;;  %v278_v22 = vld [vmem:[%s1037_s29 + $0x60] sm:$0xff] }
  0x59   : > { %572 = vmatprep.subr.bf16.mxu0 %v571_v8  ;;  %v587_v21 = vpack.c.bf16 %v277_v20, %v276_v19  ;;  %v279_v23 = vld [vmem:[%s1037_s29 + $0x68] sm:$0xff]  ;;  %v280_v25 = vld [vmem:[%s1037_s29 + $0x70] sm:$0xff]  ;;  %v281_v26 = vld [vmem:[%s1037_s29 + $0x78] sm:$0xff] }
  0x5a   : > { %252 = vperm.xlu0 %708, %v246_v9   ;;  %v591_v24 = vpack.c.bf16 %v279_v23, %v278_v22  ;;  %v595_v27 = vpack.c.bf16 %v281_v26, %v280_v25  ;;  %v501_v28 = vld [vmem:[%s236_s11] ss:$0 sm:$0xff]  ;;  %v264_v33 = vld [vmem:[#allocation2] sm:$0xff] }
  0x5b   : > { %v265_v32 = vld [vmem:[#allocation2 + $0x8] sm:$0xff] }
  0x5c   : > { %574 = vmatpush3.bf16.msra.mxu0 %v571_v8 }
  0x5d   : > { %576 = vmatprep.subr.bf16.mxu0 %v575_v12 }
  0x60   : > { %578 = vmatpush3.bf16.msra.mxu0 %v575_v12 }
  0x61   : > { %580 = vmatprep.subr.bf16.mxu0 %v579_v15 }
  0x64   : > { %582 = vmatpush3.bf16.msra.mxu0 %v579_v15 }
  0x65   : > { %584 = vmatprep.subr.bf16.mxu0 %v583_v18 }
  0x68   : > { %586 = vmatpush3.bf16.msra.mxu0 %v583_v18 }
  0x69   : > { %588 = vmatprep.subr.bf16.mxu0 %v587_v21 }
  0x6c   : > { %590 = vmatpush3.bf16.msra.mxu0 %v587_v21 }
  0x6d   : > { %592 = vmatprep.subr.bf16.mxu0 %v591_v24 }
  0x70   : > { %594 = vmatpush3.bf16.msra.mxu0 %v591_v24 }
  0x71   : > { %596 = vmatprep.subr.bf16.mxu0 %v595_v27 }
  0x74   : > { %598 = vmatpush3.bf16.msra.mxu0 %v595_v27 }
  0xd5   : > { %v250_v29 = vpop.permute.xlu0 %249 }
  0xd6   : > { %vm258_vm0 = vcmp.eq.s32.totalorder %v250_v29, %v501_v28 }
  0xd7   : > { %564 = vmatprep.mubr.msk.f32.mxu0 %vm258_vm0, %v868_v30 }
  0xd9   : > { %v253_v31 = vpop.permute.xlu0 %252 }
  0xda   : > { %vm259_vm1 = vcmp.eq.s32.totalorder %v253_v31, %v501_v28 }
  0xdb   : > { %565 = vmatmul.mubr.msk.f32.vlgmr.msra.gmra.mrb[0].mxu0 %vm259_vm1, %v868_v30 }
 0x1ac   : > { %364 = sbr.rel (%p506_p4) target bundleno = 443 (0x1bb), region = 44 }
 0x1ae   : > { %v566_v34 = vpop.f32.mrb[0].mxu0 }
 0x1af   : > { %v358_v35 = vadd.f32 %v566_v34, %v265_v32  ;;  %v348_v36 = vpop.f32.mrb[1].mxu0 }
 0x1b0   : > { %v357_v37 = vadd.f32 %v348_v36, %v264_v33 }
 0x1b1   : > { %360 = vst [vmem:[#allocation2 + $0x8] sm:$0xff] %v358_v35 }
 0x1b2   : > { %359 = vst [vmem:[#allocation2] sm:$0xff] %v357_v37 }
 0x1b8   : > { %v366_v39 = vld [vmem:[#allocation2 + $0x8] sm:$0xff] }
 0x1b9   : > { %v365_v38 = vld [vmem:[#allocation2] sm:$0xff]  ;;  %368 = vst [vmem:[%s1058_s2 + $0x8] sm:$0xff] %v366_v39 }
 0x1ba   : > { %367 = vst [vmem:[%s1058_s2] sm:$0xff] %v365_v38 }
 0x1bb PF: > { %s513_s29 = sshll.u32 %s849_s19, 8  ;;  %s383_s15 = sshll.u32 %s1058_s2, 4  ;;  %s1092_s15 = int_to_ptr.vmem [resolvable:$true] %s383_s15 }
 0x1bc   : > { %s1089_s27 = scalar_lea.hbm %s1160_s3, %s513_s29  ;;  %s1096_s18 = scalar_lea.sflag [#allocation5], %s225_s26 }
 0x1bd   : > { %s739_s4 = scalar_lea.vmem %s1092_s15, 256  ;;  %p1171_p1 = scmp.ne.s32.totalorder %s1167_s8, 0 }
 0x1be   : > { %p740_p0 = scmp.ne.s32.totalorder %s1092_s15, %s739_s4  ;;  %s869_s19 = smov [#allocation6]  }
 0x1bf   : > { %s743_s5 = sshll.u32 %s869_s19, 4  ;;  %s744_s5 = int_to_ptr.vmem [resolvable:$false] %s743_s5 }
 0x1c0   : > { %p741_p5 = pnand %p740_p0, %p1171_p1  ;;  %s745_s9 = scalar_lea.vmem %s744_s5, 512 }
 0x1c1   : > { %p746_p3 = scmp.lt.s32.totalorder %s1092_s15, %s744_s5  ;;  %p747_p10 = scmp.lt.s32.totalorder %s745_s9, %s739_s4 }
 0x1c2   : > { %p742_p7 = pneg %p741_p5 }
 0x1c3   : > { %p748_p11 = por %p747_p10, %p746_p3 }
 0x1c5   : > { %p749_p6 = pnand %p748_p11, %p742_p7 }
 0x1c7   : > { %752 = shalt.err (!%p749_p6)
}
 0x1c8   : > { %s753_s2 = scalar_lea.hbm %s1089_s27, 256  ;;  %s757_s23 = scalar_lea.hbm %s1160_s3, 768 }
 0x1c9   : > { %p754_p9 = scmp.ne.s32.totalorder %s1089_s27, %s753_s2  ;;  %p758_p2 = scmp.lt.u32.totalorder %s1089_s27, %s1160_s3 }
 0x1ca   : > { %p759_p8 = scmp.lt.u32.totalorder %s757_s23, %s753_s2  ;;  %p761_p0 = scmp.lt.u32.totalorder %s753_s2, %s1089_s27 }
 0x1cb   : > { %p755_p13 = pnand %p754_p9, %p1171_p1 }
 0x1cc   : > { %p760_p4 = por %p759_p8, %p758_p2 }
 0x1cd   : > { %p756_p12 = pneg %p755_p13 }
 0x1ce   : > { %p762_p5 = por %p761_p0, %p760_p4 }
 0x1d0   : > { %p763_p7 = pnand %p762_p5, %p756_p12 }
 0x1d2   : > { %766 = shalt.err (!%p763_p7)
}
 0x1d3   : > { %s870_s24 = smov 128   ;;  %s871_s28 = smov 8  }
 0x1d4   : > { %601 = dma.vmem_to_hbm [thread:$0]  (%p1171_p1), %s1092_s15, 256, %s1089_s27, %s1096_s18, %s870_s24, %s870_s24, %s871_s28  }
 0x1d5 PF: > { %p612_p3 = scmp.ge.s32.totalorder %s861_s22, 2  ;;  %s398_s4 = sand.u32 1, %s821_s12  }
 0x1d6   : > { %p1172_p10 = scmp.ne.s32.totalorder %s1168_s10, 0  ;;  %s399_s19 = scalar_lea.sflag [#allocation5], %s398_s4 }
 0x1d8   : > { %p608_p11 = pnand %p612_p3, %p1172_p10 }
 0x1da   : > { %816 = dma.done.wait (!%p608_p11), %s399_s19, 256  }
 0x1db   : > { %818 = vsyncadd (!%p608_p11), %s399_s19, 4294967040  ;;  %s19_s22 = sadd.s32 1, %s861_s22   ;;  %s1173_s8 = sld [smem:[#allocation9_spill]] }
 0x1dc   : > { %p16_p6 = scmp.ge.s32.totalorder %s19_s22, 11   ;;  %s1174_s12 = smov %s825_s13 }
 0x1dd   : > { %s1175_s13 = smov %s829_s14  ;;  %s1176_s14 = smov %s978_s7 }
 0x1de   : > { %s1177_s15 = smov %s837_s16  ;;  %s1178_s16 = smov %s841_s17 }
 0x1df   : > { %s1179_s17 = smov %s966_s30  ;;  %s1180_s18 = smov %s853_s20 }
 0x1e0   : > { %s1181_s19 = smov %s857_s21  ;;  %s1182_s20 = smov %s1185_s25 }
 0x1e1   : > { %s1183_s21 = smov %s1173_s8  ;;  %18 = sbr.rel (!%p16_p6) target bundleno = 11 (0xb), region = 91 }
 0x1e8   :  { %404 = vsyncpa [#allocation4], 1 }
 0x1e9   :  { %406 = vsyncpa [#allocation4 + $0x1], 1 }
 0x1ea   :  { %407 = vsyncpa [#allocation5], 1 }
 0x1eb   :  { %409 = vsyncpa [#allocation5 + $0x1], 1 }

</bundles_post_ra>
